<compile_context>
chip_gen: v6e
topology: v6e:2x2x1
jax: 0.10.0
libtpu: 0.0.40
codegen_flags: <defaults>
</compile_context>

<pallas_src>
import jax
import jax.numpy as jnp
from jax.experimental import pallas as pl
from jax.experimental.pallas import tpu as pltpu


def _round_up(x, m):
    return (x + m - 1) // m * m


def _sigmoid(x):
    # Numerically stable sigmoid routed through the EUP tanh unit.
    return 0.5 * (jnp.tanh(0.5 * x) + 1.0)


def irt_kernel(stu_id_ref, exer_id_ref, stu_tab_ref, exer_tab_ref, out_ref):
    # stu_id_ref / exer_id_ref : (1, TB) int32  -- lane-dense batch tile
    # stu_tab_ref              : (Sn, 1) f32    -- student_emb.weight
    # exer_tab_ref             : (En, 2) f32    -- col 0 = k_difficulty,
    #                                              col 1 = e_discrimination
    # out_ref                  : (1, TB) f32
    tb = out_ref.shape[1]
    sn = stu_tab_ref.shape[0]
    en = exer_tab_ref.shape[0]

    stu_id = stu_id_ref[...]     # (1, TB)
    exer_id = exer_id_ref[...]   # (1, TB)

    # --- Student gather: compare/select on VPU, sublane reduce on XLU. ---
    s_iota = jax.lax.broadcasted_iota(jnp.int32, (sn, tb), 0)
    stu_raw = jnp.sum(jnp.where(s_iota == stu_id, stu_tab_ref[...], 0.0),
                      axis=0, keepdims=True)                    # (1, TB)

    # --- Exercise gather: one mask, two selected reductions (fused table). ---
    e_iota = jax.lax.broadcasted_iota(jnp.int32, (en, tb), 0)
    e_mask = e_iota == exer_id                                  # (En, TB)
    exer_tab = exer_tab_ref[...]                                # (En, 2)
    kd_raw = jnp.sum(jnp.where(e_mask, exer_tab[:, 0:1], 0.0),
                     axis=0, keepdims=True)                     # (1, TB)
    ed_raw = jnp.sum(jnp.where(e_mask, exer_tab[:, 1:2], 0.0),
                     axis=0, keepdims=True)                     # (1, TB)

    # --- Three plain sigmoids (EUP has its own slot), then the IRT link. ---
    stu_emb = _sigmoid(stu_raw)
    k_difficulty = _sigmoid(kd_raw)
    e_discrimination = _sigmoid(ed_raw)

    out_ref[...] = _sigmoid(1.7 * e_discrimination * (stu_emb - k_difficulty))


def prepare_irt_params(stu_table, kdiff_table, edisc_table):
    """One-time parameter preparation (hoisted out of the forward path).

    Returns (stu_table_f32 (Sn,1), exer_table_f32 (En,2)) where the exercise
    table fuses k_difficulty (col 0) and e_discrimination (col 1)."""
    stu = jnp.asarray(stu_table, jnp.float32)
    exer = jnp.concatenate(
        [jnp.asarray(kdiff_table, jnp.float32),
         jnp.asarray(edisc_table, jnp.float32)], axis=1)
    return stu, exer


def irt_forward(stu_id, exer_id, stu_table_f32, exer_table_f32, *,
                block_b=4096):
    """stu_id, exer_id: (B,) int.  Tables from prepare_irt_params().
    Returns (B,) float32 (matches torch.squeeze(output, dim=1))."""
    B = int(stu_id.shape[0])
    Sn = stu_table_f32.shape[0]
    En = exer_table_f32.shape[0]

    # Lane-dense, 128-aligned batch tile.  Cap tb at ~half the (padded) batch
    # so the "parallel" grid keeps >= 2 tiles for large B (both v7x TCs busy),
    # and defensively round any caller-supplied block_b up to 128.
    half = _round_up(pl.cdiv(B, 2), 128)
    tb = _round_up(min(block_b, half), 128)
    Bp = _round_up(B, tb)

    pad = Bp - B
    stu_id_p = jnp.pad(stu_id.astype(jnp.int32), (0, pad)).reshape(1, Bp)
    exer_id_p = jnp.pad(exer_id.astype(jnp.int32), (0, pad)).reshape(1, Bp)

    grid = (Bp // tb,)
    out = pl.pallas_call(
        irt_kernel,
        out_shape=jax.ShapeDtypeStruct((1, Bp), jnp.float32),
        grid=grid,
        in_specs=[
            pl.BlockSpec((1, tb), lambda i: (0, i)),     # student ids (tile)
            pl.BlockSpec((1, tb), lambda i: (0, i)),     # exercise ids (tile)
            pl.BlockSpec((Sn, 1), lambda i: (0, 0)),     # student table (resident)
            pl.BlockSpec((En, 2), lambda i: (0, 0)),     # fused exercise table
        ],
        out_specs=pl.BlockSpec((1, tb), lambda i: (0, i)),
        compiler_params=pltpu.CompilerParams(
            dimension_semantics=("parallel",)),
    )(stu_id_p, exer_id_p, stu_table_f32, exer_table_f32)

    return out[0, :B]


def xavier_normal(key, shape):
    # nn.init.xavier_normal_ for a (fan_out, fan_in) = (N, 1) embedding weight.
    fan_out, fan_in = shape
    std = jnp.sqrt(2.0 / (fan_in + fan_out))
    return jax.random.normal(key, shape, dtype=jnp.float32) * std


if __name__ == "__main__":
    student_n = 32
    exer_n = 64
    batch = 8

    key = jax.random.PRNGKey(0)
    k1, k2, k3, k4, k5 = jax.random.split(key, 5)

    # Deterministic parameter init (shapes from IRT.__init__).
    stu_table = xavier_normal(k1, (student_n, 1))     # student_emb.weight
    kdiff_table = xavier_normal(k2, (exer_n, 1))      # k_difficulty.weight
    edisc_table = xavier_normal(k3, (exer_n, 1))      # e_discrimination.weight

    stu_id = jax.random.randint(k4, (batch,), 0, student_n, dtype=jnp.int32)
    exer_id = jax.random.randint(k5, (batch,), 0, exer_n, dtype=jnp.int32)

    # One-time parameter prep (fused exercise table, f32 casts).
    stu_tab_f32, exer_tab_f32 = prepare_irt_params(
        stu_table, kdiff_table, edisc_table)

    out = irt_forward(stu_id, exer_id, stu_tab_f32, exer_tab_f32)
    out = jax.block_until_ready(out)

    # Pure-JAX reference (exact PyTorch formula).
    ref_stu = 1.0 / (1.0 + jnp.exp(-stu_table[stu_id, 0]))
    ref_kd = 1.0 / (1.0 + jnp.exp(-kdiff_table[exer_id, 0]))
    ref_ed = 1.0 / (1.0 + jnp.exp(-edisc_table[exer_id, 0]))
    ref = 1.0 / (1.0 + jnp.exp(-ref_ed * 1.7 * (ref_stu - ref_kd)))

    assert out.shape == (batch,), out.shape
    assert jnp.allclose(out, ref, atol=1e-5, rtol=1e-5), (out, ref)

    print("KERNEL_OK")
</pallas_src>

<mosaic_0001>
module attributes {stable_mosaic.version = 11 : i64} {
  func.func @irt_kernel(%arg0: i32, %arg1: memref<1x128xi32, #tpu.memory_space<vmem>>, %arg2: memref<1x128xi32, #tpu.memory_space<vmem>>, %arg3: memref<32x1xf32, #tpu.memory_space<vmem>>, %arg4: memref<64x2xf32, #tpu.memory_space<vmem>>, %arg5: memref<1x128xf32, #tpu.memory_space<vmem>>) attributes {dimension_semantics = [#tpu.dimension_semantics<parallel>], iteration_bounds = array<i64: 1>, scalar_prefetch = 0 : i64, scratch_operands = 0 : i64, tpu.core_type = #tpu.core_type<tc>, window_params = [{transform_indices = @transform_0, window_bounds = array<i64: 1, 128>}, {transform_indices = @transform_1, window_bounds = array<i64: 1, 128>}, {pipeline_mode = #tpu.pipeline_mode<synchronous>, transform_indices = @transform_2, window_bounds = array<i64: 32, 1>}, {pipeline_mode = #tpu.pipeline_mode<synchronous>, transform_indices = @transform_3, window_bounds = array<i64: 64, 2>}, {transform_indices = @transform_4, window_bounds = array<i64: 1, 128>}]} {
    %c0 = arith.constant 0 : index
    %c0_0 = arith.constant 0 : index
    %0 = vector.load %arg1[%c0, %c0_0] : memref<1x128xi32, #tpu.memory_space<vmem>>, vector<1x128xi32>
    %c0_1 = arith.constant 0 : index
    %c0_2 = arith.constant 0 : index
    %1 = vector.load %arg2[%c0_1, %c0_2] : memref<1x128xi32, #tpu.memory_space<vmem>>, vector<1x128xi32>
    %2 = tpu.iota {dimensions = array<i32: 0>} : vector<32x128xi32>
    %3 = vector.broadcast %0 : vector<1x128xi32> to vector<32x128xi32>
    %4 = arith.cmpi eq, %2, %3 : vector<32x128xi32>
    %c0_3 = arith.constant 0 : index
    %c0_4 = arith.constant 0 : index
    %5 = vector.load %arg3[%c0_3, %c0_4] : memref<32x1xf32, #tpu.memory_space<vmem>>, vector<32x1xf32>
    %cst = arith.constant 0.000000e+00 : f32
    %6 = vector.shape_cast %5 : vector<32x1xf32> to vector<32x1xf32>
    %7 = vector.broadcast %6 : vector<32x1xf32> to vector<32x128xf32>
    %8 = vector.broadcast %cst : f32 to vector<32x128xf32>
    %9 = arith.select %4, %7, %8 : vector<32x128xi1>, vector<32x128xf32>
    %cst_5 = arith.constant dense<0.000000e+00> : vector<128xf32>
    %10 = vector.multi_reduction <add>, %9, %cst_5 [0] : vector<32x128xf32> to vector<128xf32>
    %11 = vector.shape_cast %10 : vector<128xf32> to vector<1x128xf32>
    %12 = tpu.iota {dimensions = array<i32: 0>} : vector<64x128xi32>
    %13 = vector.broadcast %1 : vector<1x128xi32> to vector<64x128xi32>
    %14 = arith.cmpi eq, %12, %13 : vector<64x128xi32>
    %c0_6 = arith.constant 0 : index
    %c0_7 = arith.constant 0 : index
    %15 = vector.load %arg4[%c0_6, %c0_7] : memref<64x2xf32, #tpu.memory_space<vmem>>, vector<64x2xf32>
    %16 = vector.extract_strided_slice %15 {offsets = [0, 0], sizes = [64, 1], strides = [1, 1]} : vector<64x2xf32> to vector<64x1xf32>
    %cst_8 = arith.constant 0.000000e+00 : f32
    %17 = vector.shape_cast %16 : vector<64x1xf32> to vector<64x1xf32>
    %18 = vector.broadcast %17 : vector<64x1xf32> to vector<64x128xf32>
    %19 = vector.broadcast %cst_8 : f32 to vector<64x128xf32>
    %20 = arith.select %14, %18, %19 : vector<64x128xi1>, vector<64x128xf32>
    %cst_9 = arith.constant dense<0.000000e+00> : vector<128xf32>
    %21 = vector.multi_reduction <add>, %20, %cst_9 [0] : vector<64x128xf32> to vector<128xf32>
    %22 = vector.shape_cast %21 : vector<128xf32> to vector<1x128xf32>
    %23 = vector.extract_strided_slice %15 {offsets = [0, 1], sizes = [64, 1], strides = [1, 1]} : vector<64x2xf32> to vector<64x1xf32>
    %cst_10 = arith.constant 0.000000e+00 : f32
    %24 = vector.shape_cast %23 : vector<64x1xf32> to vector<64x1xf32>
    %25 = vector.broadcast %24 : vector<64x1xf32> to vector<64x128xf32>
    %26 = vector.broadcast %cst_10 : f32 to vector<64x128xf32>
    %27 = arith.select %14, %25, %26 : vector<64x128xi1>, vector<64x128xf32>
    %cst_11 = arith.constant dense<0.000000e+00> : vector<128xf32>
    %28 = vector.multi_reduction <add>, %27, %cst_11 [0] : vector<64x128xf32> to vector<128xf32>
    %29 = vector.shape_cast %28 : vector<128xf32> to vector<1x128xf32>
    %cst_12 = arith.constant 5.000000e-01 : f32
    %30 = vector.broadcast %cst_12 : f32 to vector<1x128xf32>
    %31 = arith.mulf %30, %11 : vector<1x128xf32>
    %32 = math.tanh %31 : vector<1x128xf32>
    %cst_13 = arith.constant 1.000000e+00 : f32
    %33 = vector.broadcast %cst_13 : f32 to vector<1x128xf32>
    %34 = arith.addf %32, %33 : vector<1x128xf32>
    %cst_14 = arith.constant 5.000000e-01 : f32
    %35 = vector.broadcast %cst_14 : f32 to vector<1x128xf32>
    %36 = arith.mulf %35, %34 : vector<1x128xf32>
    %cst_15 = arith.constant 5.000000e-01 : f32
    %37 = vector.broadcast %cst_15 : f32 to vector<1x128xf32>
    %38 = arith.mulf %37, %22 : vector<1x128xf32>
    %39 = math.tanh %38 : vector<1x128xf32>
    %cst_16 = arith.constant 1.000000e+00 : f32
    %40 = vector.broadcast %cst_16 : f32 to vector<1x128xf32>
    %41 = arith.addf %39, %40 : vector<1x128xf32>
    %cst_17 = arith.constant 5.000000e-01 : f32
    %42 = vector.broadcast %cst_17 : f32 to vector<1x128xf32>
    %43 = arith.mulf %42, %41 : vector<1x128xf32>
    %cst_18 = arith.constant 5.000000e-01 : f32
    %44 = vector.broadcast %cst_18 : f32 to vector<1x128xf32>
    %45 = arith.mulf %44, %29 : vector<1x128xf32>
    %46 = math.tanh %45 : vector<1x128xf32>
    %cst_19 = arith.constant 1.000000e+00 : f32
    %47 = vector.broadcast %cst_19 : f32 to vector<1x128xf32>
    %48 = arith.addf %46, %47 : vector<1x128xf32>
    %cst_20 = arith.constant 5.000000e-01 : f32
    %49 = vector.broadcast %cst_20 : f32 to vector<1x128xf32>
    %50 = arith.mulf %49, %48 : vector<1x128xf32>
    %cst_21 = arith.constant 1.700000e+00 : f32
    %51 = vector.broadcast %cst_21 : f32 to vector<1x128xf32>
    %52 = arith.mulf %51, %50 : vector<1x128xf32>
    %53 = arith.subf %36, %43 : vector<1x128xf32>
    %54 = arith.mulf %52, %53 : vector<1x128xf32>
    %cst_22 = arith.constant 5.000000e-01 : f32
    %55 = vector.broadcast %cst_22 : f32 to vector<1x128xf32>
    %56 = arith.mulf %55, %54 : vector<1x128xf32>
    %57 = math.tanh %56 : vector<1x128xf32>
    %cst_23 = arith.constant 1.000000e+00 : f32
    %58 = vector.broadcast %cst_23 : f32 to vector<1x128xf32>
    %59 = arith.addf %57, %58 : vector<1x128xf32>
    %cst_24 = arith.constant 5.000000e-01 : f32
    %60 = vector.broadcast %cst_24 : f32 to vector<1x128xf32>
    %61 = arith.mulf %60, %59 : vector<1x128xf32>
    %c0_25 = arith.constant 0 : index
    %c0_26 = arith.constant 0 : index
    %62 = vector.load %arg5[%c0_25, %c0_26] : memref<1x128xf32, #tpu.memory_space<vmem>>, vector<1x128xf32>
    tpu.vector_store %arg5[%c0_25, %c0_26], %61 {strides = array<i32>} : memref<1x128xf32, #tpu.memory_space<vmem>>, vector<1x128xf32>,
    return
  }
  func.func @transform_0(%arg0: i32) -> (i32, i32) {
    %c0_i32 = arith.constant 0 : i32
    %c0_i32_0 = arith.constant 0 : i32
    return %c0_i32, %arg0 : i32, i32
  }
  func.func @transform_1(%arg0: i32) -> (i32, i32) {
    %c0_i32 = arith.constant 0 : i32
    %c0_i32_0 = arith.constant 0 : i32
    return %c0_i32, %arg0 : i32, i32
  }
  func.func @transform_2(%arg0: i32) -> (i32, i32) {
    %c0_i32 = arith.constant 0 : i32
    %c0_i32_0 = arith.constant 0 : i32
    %c0_i32_1 = arith.constant 0 : i32
    return %c0_i32, %c0_i32_0 : i32, i32
  }
  func.func @transform_3(%arg0: i32) -> (i32, i32) {
    %c0_i32 = arith.constant 0 : i32
    %c0_i32_0 = arith.constant 0 : i32
    %c0_i32_1 = arith.constant 0 : i32
    return %c0_i32, %c0_i32_0 : i32, i32
  }
  func.func @transform_4(%arg0: i32) -> (i32, i32) {
    %c0_i32 = arith.constant 0 : i32
    %c0_i32_0 = arith.constant 0 : i32
    return %c0_i32, %arg0 : i32, i32
  }
}

</mosaic_0001>

<bundles_post_ra>
// kernel: tpu_custom_call.1
= control target key start
LH: loop header
LB: loop body
LE: loop exit
PB: predicated region body
PF: predicated region fallthrough
CT: control target
= control target key end

     0   :  { %v283_v1 = vmov 1   ;;  %v284_v2 = vmov 0   ;;  %s374_s0 = inlined_call_operand.vmem [shape: s32[1,128], index: 0, kind: input, shape index: {}]   ;;  %s375_s1 = inlined_call_operand.vmem [shape: s32[1,128], index: 1, kind: input, shape index: {}]   ;;  %s376_s2 = inlined_call_operand.vmem [shape: f32[32,1], index: 2, kind: input, shape index: {}]   ;;  %s377_s3 = inlined_call_operand.vmem [shape: f32[64,2], index: 3, kind: input, shape index: {}]   ;;  %s378_s4 = inlined_call_operand.hbm [shape: f32[1,128], index: 4, kind: output, shape index: {}]  }
   0x1   :  { %v86_v0 = vld [vmem:[%s377_s3] sm:$0xff]  ;;  %248 = vset.pattern.permute.xlu1 %v283_v1  ;;  %247 = vset.pattern.permute.xlu0 %v284_v2  ;;  %v87_v3 = vld [vmem:[%s377_s3 + $0x8] sm:$0xff] }
   0x2   :  { %156 = vperm.xlu1 %248, %v86_v0   ;;  %96 = vperm.xlu0 %247, %v86_v0  }
   0x3   :  { %9 = vsyncpa [#allocation3], 0  ;;  %v88_v4 = vld [vmem:[%s377_s3 + $0x10] sm:$0xff]  ;;  %v89_v5 = vld [vmem:[%s377_s3 + $0x18] sm:$0xff]  ;;  %v20_v20 = vlaneseq }
   0x4   :  { %v90_v6 = vld [vmem:[%s377_s3 + $0x20] sm:$0xff]  ;;  %v34_v8 = vld [vmem:[%s376_s2 + $0x8] sm:$0xff]  ;;  %v35_v10 = vld [vmem:[%s376_s2 + $0x10] sm:$0xff] }
   0x5   :  { %v33_v7 = vld [vmem:[%s376_s2] sm:$0xff]  ;;  %v91_v9 = vld [vmem:[%s377_s3 + $0x28] sm:$0xff]  ;;  %v92_v11 = vld [vmem:[%s377_s3 + $0x30] sm:$0xff]  ;;  %v21_v23 = vshrl.u32 %v20_v20, 7 }
   0x6   :  { %160 = vperm.xlu1 %248, %v87_v3   ;;  %101 = vperm.xlu0 %247, %v87_v3   ;;  %v36_v12 = vld [vmem:[%s376_s2 + $0x18] sm:$0xff]  ;;  %v350_v28 = vld [vmem:[%s375_s1] ss:$0 sm:$0xff] }
   0x7   :  { %v93_v13 = vld [vmem:[%s377_s3 + $0x38] sm:$0xff]  ;;  %v22_v26 = vadd.s32 8, %v21_v23  ;;  %v23_v27 = vadd.s32 16, %v21_v23  ;;  %v24_v30 = vadd.s32 24, %v21_v23  ;;  %v70_v32 = vadd.s32 32, %v21_v23 }
   0x8   :  { %vm78_vm1 = vcmp.eq.s32.totalorder %v21_v23, %v350_v28  ;;  %v242_v34 = vld [vmem:[%s374_s0] ss:$0 sm:$0xff]  ;;  %v71_v41 = vadd.s32 40, %v21_v23  ;;  %v72_v46 = vadd.s32 48, %v21_v23  ;;  %v73_v56 = vadd.s32 56, %v21_v23  ;;  %s285_s0 = smov [#allocation2]  }
   0x9   :  { %vm79_vm0 = vcmp.eq.s32.totalorder %v22_v26, %v350_v28  ;;  %vm80_vm2 = vcmp.eq.s32.totalorder %v23_v27, %v350_v28  ;;  %vm81_vm3 = vcmp.eq.s32.totalorder %v24_v30, %v350_v28  ;;  %vm82_vm4 = vcmp.eq.s32.totalorder %v70_v32, %v350_v28  ;;  %s234_s1 = sshll.u32 %s285_s0, 4  ;;  %s235_s1 = int_to_ptr.vmem [resolvable:$true] %s234_s1 }
   0xa   :  { %164 = vperm.xlu1 %248, %v88_v4   ;;  %106 = vperm.xlu0 %247, %v88_v4   ;;  %vm29_vm5 = vcmp.eq.s32.totalorder %v21_v23, %v242_v34  ;;  %vm30_vm6 = vcmp.eq.s32.totalorder %v22_v26, %v242_v34  ;;  %vm31_vm7 = vcmp.eq.s32.totalorder %v23_v27, %v242_v34  ;;  %s261_s15 = scalar_lea.vmem %s235_s1, 16  ;;  %s265_s16 = scalar_lea.vmem %s235_s1, 32 }
   0xb   :  { %vm83_vm8 = vcmp.eq.s32.totalorder %v71_v41, %v350_v28  ;;  %vm84_vm9 = vcmp.eq.s32.totalorder %v72_v46, %v350_v28  ;;  %vm32_vm10 = vcmp.eq.s32.totalorder %v24_v30, %v242_v34  ;;  %vm85_vm11 = vcmp.eq.s32.totalorder %v73_v56, %v350_v28  ;;  %p262_p0 = scmp.ne.s32.totalorder %s235_s1, %s261_s15  ;;  %p266_p1 = scmp.lt.s32.totalorder %s235_s1, %s235_s1 }
   0xc   :  { %p267_p2 = scmp.lt.s32.totalorder %s265_s16, %s261_s15 }
   0xe   :  { %168 = vperm.xlu1 %248, %v89_v5   ;;  %111 = vperm.xlu0 %247, %v89_v5   ;;  %p268_p3 = por %p267_p2, %p266_p1 }
  0x10   :  { %p269_p4 = pnand %p268_p3, %p262_p0 }
  0x12   :  { %172 = vperm.xlu1 %248, %v90_v6   ;;  %116 = vperm.xlu0 %247, %v90_v6  }
  0x16   :  { %249 = vset.pattern.permute.xlu1 %v284_v2  ;;  %39 = vperm.xlu0 %247, %v33_v7  }
  0x17   :  { %44 = vperm.xlu1 %249, %v34_v8  }
  0x1a   :  { %121 = vperm.xlu0 %247, %v91_v9  }
  0x1b   :  { %250 = vset.pattern.permute.xlu1 %v283_v1 }
  0x1c   :  { %176 = vperm.xlu1 %250, %v91_v9  }
  0x1e   :  { %49 = vperm.xlu0 %247, %v35_v10  }
  0x20   :  { %251 = vset.pattern.permute.xlu1 %v284_v2 }
  0x21   :  { %126 = vperm.xlu1 %251, %v92_v11  }
  0x22   :  { %252 = vset.pattern.permute.xlu0 %v283_v1 }
  0x23   :  { %180 = vperm.xlu0 %252, %v92_v11  }
  0x25   :  { %54 = vperm.xlu1 %251, %v36_v12  }
  0x27   :  { %184 = vperm.xlu0 %252, %v93_v13  }
  0x29   :  { %131 = vperm.xlu1 %251, %v93_v13  }
  0x7d   :  { %v157_v14 = vpop.permute.xlu1 %156  ;;  %v97_v15 = vpop.permute.xlu0 %96 }
  0x7e   :  { %v187_v36 = vsel %vm78_vm1, %v157_v14, 0.0  ;;  %v134_v42 = vsel %vm78_vm1, %v97_v15, 0.0 }
  0x81   :  { %v161_v16 = vpop.permute.xlu1 %160  ;;  %v102_v17 = vpop.permute.xlu0 %101 }
  0x82   :  { %v188_v33 = vsel %vm79_vm0, %v161_v16, 0.0  ;;  %v135_v37 = vsel %vm79_vm0, %v102_v17, 0.0 }
  0x83   :  { %v195_v40 = vadd.f32 %v188_v33, %v187_v36  ;;  %v142_v47 = vadd.f32 %v135_v37, %v134_v42 }
  0x85   :  { %v165_v18 = vpop.permute.xlu1 %164  ;;  %v107_v19 = vpop.permute.xlu0 %106 }
  0x86   :  { %v189_v38 = vsel %vm80_vm2, %v165_v18, 0.0  ;;  %v136_v43 = vsel %vm80_vm2, %v107_v19, 0.0 }
  0x87   :  { %v196_v48 = vadd.f32 %v195_v40, %v189_v38  ;;  %v143_v53 = vadd.f32 %v142_v47, %v136_v43 }
  0x89   :  { %v169_v21 = vpop.permute.xlu1 %168  ;;  %v112_v22 = vpop.permute.xlu0 %111 }
  0x8a   :  { %v190_v44 = vsel %vm81_vm3, %v169_v21, 0.0  ;;  %v137_v49 = vsel %vm81_vm3, %v112_v22, 0.0 }
  0x8b   :  { %v197_v54 = vadd.f32 %v196_v48, %v190_v44  ;;  %v144_v60 = vadd.f32 %v143_v53, %v137_v49 }
  0x8d   :  { %v173_v24 = vpop.permute.xlu1 %172  ;;  %v117_v25 = vpop.permute.xlu0 %116 }
  0x8e   :  { %v191_v50 = vsel %vm82_vm4, %v173_v24, 0.0  ;;  %v138_v57 = vsel %vm82_vm4, %v117_v25, 0.0 }
  0x8f   :  { %v198_v61 = vadd.f32 %v197_v54, %v191_v50  ;;  %v145_v2 = vadd.f32 %v144_v60, %v138_v57 }
  0x91   :  { %v40_v29 = vpop.permute.xlu0 %39 }
  0x92   :  { %v45_v31 = vpop.permute.xlu1 %44  ;;  %v57_v51 = vsel %vm29_vm5, %v40_v29, 0.0 }
  0x93   :  { %v58_v52 = vsel %vm30_vm6, %v45_v31, 0.0 }
  0x94   :  { %v61_v62 = vadd.f32 %v58_v52, %v57_v51 }
  0x95   :  { %v122_v35 = vpop.permute.xlu0 %121 }
  0x96   :  { %v139_v0 = vsel %vm83_vm8, %v122_v35, 0.0 }
  0x97   :  { %v177_v39 = vpop.permute.xlu1 %176  ;;  %v146_v8 = vadd.f32 %v145_v2, %v139_v0 }
  0x98   :  { %v192_v58 = vsel %vm83_vm8, %v177_v39, 0.0 }
  0x99   :  { %v50_v45 = vpop.permute.xlu0 %49  ;;  %v199_v3 = vadd.f32 %v198_v61, %v192_v58 }
  0x9a   :  { %v59_v59 = vsel %vm31_vm7, %v50_v45, 0.0 }
  0x9b   :  { %v62_v4 = vadd.f32 %v61_v62, %v59_v59 }
  0x9c   :  { %v127_v55 = vpop.permute.xlu1 %126 }
  0x9d   :  { %v140_v6 = vsel %vm84_vm9, %v127_v55, 0.0 }
  0x9e   :  { %v181_v63 = vpop.permute.xlu0 %180  ;;  %v147_v13 = vadd.f32 %v146_v8, %v140_v6 }
  0x9f   :  { %v193_v1 = vsel %vm84_vm9, %v181_v63, 0.0 }
  0xa0   :  { %v55_v5 = vpop.permute.xlu1 %54  ;;  %v200_v9 = vadd.f32 %v199_v3, %v193_v1 }
  0xa1   :  { %v60_v7 = vsel %vm32_vm10, %v55_v5, 0.0 }
  0xa2   :  { %v63_v10 = vadd.f32 %v62_v4, %v60_v7  ;;  %v185_v11 = vpop.permute.xlu0 %184 }
  0xa3   :  { %v194_v12 = vsel %vm85_vm11, %v185_v11, 0.0 }
  0xa4   :  { %v64_v14 = vrot.slane %v63_v10, 4  ;;  %v201_v15 = vadd.f32 %v200_v9, %v194_v12  ;;  %v132_v16 = vpop.permute.xlu1 %131 }
  0xa5   :  { %v141_v17 = vsel %vm85_vm11, %v132_v16, 0.0 }
  0xa6   :  { %v65_v18 = vadd.f32 %v64_v14, %v63_v10  ;;  %v202_v19 = vrot.slane %v201_v15, 4  ;;  %v148_v20 = vadd.f32 %v147_v13, %v141_v17 }
  0xa8   :  { %v66_v21 = vrot.slane %v65_v18, 2  ;;  %v203_v22 = vadd.f32 %v202_v19, %v201_v15  ;;  %v149_v23 = vrot.slane %v148_v20, 4 }
  0xaa   :  { %v67_v24 = vadd.f32 %v66_v21, %v65_v18  ;;  %v204_v25 = vrot.slane %v203_v22, 2  ;;  %v150_v26 = vadd.f32 %v149_v23, %v148_v20 }
  0xac   :  { %v68_v27 = vrot.slane %v67_v24, 1  ;;  %v205_v28 = vadd.f32 %v204_v25, %v203_v22  ;;  %v151_v29 = vrot.slane %v150_v26, 2 }
  0xae   :  { %v69_v30 = vadd.f32 %v68_v27, %v67_v24  ;;  %v206_v31 = vrot.slane %v205_v28, 1  ;;  %v152_v32 = vadd.f32 %v151_v29, %v150_v26 }
  0xb0   :  { %v208_v33 = vmul.f32 0.5, %v69_v30  ;;  %v207_v34 = vadd.f32 %v206_v31, %v205_v28  ;;  %v153_v35 = vrot.slane %v152_v32, 1 }
  0xb2   :  { %253 = vtanh.f32 %v208_v33  ;;  %v216_v36 = vmul.f32 0.5, %v207_v34  ;;  %v154_v37 = vadd.f32 %v153_v35, %v152_v32 }
  0xb4   :  { %255 = vtanh.f32 %v216_v36  ;;  %v212_v38 = vmul.f32 0.5, %v154_v37 }
  0xb6   :  { %257 = vtanh.f32 %v212_v38 }
  0xbf   :  { %v254_v39 = vpop.eup %253 }
  0xc0   :  { %v210_v41 = vadd.f32 1.0, %v254_v39 }
  0xc1   :  { %v256_v40 = vpop.eup %255 }
  0xc2   :  { %v218_v42 = vadd.f32 1.0, %v256_v40  ;;  %v211_v46 = vmul.f32 0.5, %v210_v41 }
  0xc3   :  { %v258_v43 = vpop.eup %257 }
  0xc4   :  { %v214_v44 = vadd.f32 1.0, %v258_v43  ;;  %v219_v45 = vmul.f32 0.5, %v218_v42 }
  0xc6   :  { %v215_v47 = vmul.f32 0.5, %v214_v44  ;;  %v220_v48 = vmul.f32 1.7, %v219_v45 }
  0xc8   :  { %v221_v49 = vsub.f32 %v211_v46, %v215_v47 }
  0xca   :  { %v222_v50 = vmul.f32 %v221_v49, %v220_v48 }
  0xcc   :  { %v223_v51 = vmul.f32 0.5, %v222_v50 }
  0xce   :  { %259 = vtanh.f32 %v223_v51 }
  0xdb   :  { %v260_v52 = vpop.eup %259 }
  0xdc   :  { %v225_v53 = vadd.f32 1.0, %v260_v52 }
  0xde   :  { %v226_v54 = vmul.f32 0.5, %v225_v53 }
  0xe0   :  { %227 = vst [vmem:[#allocation2] sm:$0x1] %v226_v54 }
  0xe1   :  { %272 = shalt.err (!%p269_p4)
}
  0xe2   :  { %237 = dma.vmem_to_hbm [thread:$0]  %s235_s1, 16, %s378_s4, [#allocation3]  }
  0xe3   :  { %281 = dma.done.wait [#allocation3], 16  }
  0xe4   :  { %282 = vsyncadd [#allocation3], 4294967280 }
  0xe5   :  { %241 = vsyncpa [#allocation3], 1 }

</bundles_post_ra>
